<compile_context>
chip_gen: v5e
topology: v5e:2x2
jax: 0.10.0
libtpu: 0.0.40
codegen_flags: <defaults>
</compile_context>

<pallas_src>
import jax
import jax.numpy as jnp
from jax.experimental import pallas as pl
from jax.experimental.pallas import tpu as pltpu


ALPHA = 0.25
GAMMA = 2.0
SOFTMAX_EPS = 1e-6   # self.eps passed from FocalLoss.forward into focal_loss
ONEHOT_EPS = 1e-6    # one_hot()'s default eps


def _round_up(x: int, m: int) -> int:
    return ((x + m - 1) // m) * m


def _pick_tile_n(hw_pad: int, cap: int) -> int:
    """Largest lane-dense pixel tile (multiple of 128) <= cap dividing hw_pad."""
    if hw_pad <= cap:
        return hw_pad
    t = (cap // 128) * 128
    while t >= 128:
        if hw_pad % t == 0:
            return t
        t -= 128
    return hw_pad  # fallback: single full-row tile


def focal_loss_pallas(logits_nchw: jax.Array, target_nhw: jax.Array, *,
                      alpha: float = ALPHA, gamma: float = GAMMA,
                      tile_n: int = 32768) -> jax.Array:
    """logits_nchw: (N, C, H, W) float; target_nhw: (N, H, W) int labels.
    Returns per-pixel loss of shape (N, H, W) (reduction='none')."""
    N, C, H, W = logits_nchw.shape
    HW = H * W

    # NCHW is class-major already: no transpose, reshapes are free.
    x3 = logits_nchw.reshape(N, C, HW).astype(jnp.float32)
    t3 = target_nhw.reshape(N, 1, HW).astype(jnp.int32)

    # Pad the pixel (lane) axis to a multiple of 128 so blocks are lane-dense.
    HW_pad = _round_up(HW, 128)
    if HW_pad != HW:
        pad = HW_pad - HW
        x3 = jnp.pad(x3, ((0, 0), (0, 0), (0, pad)))
        t3 = jnp.pad(t3, ((0, 0), (0, 0), (0, pad)))

    tn = _pick_tile_n(HW_pad, tile_n)
    n_tiles = HW_pad // tn

    gamma_is_two = float(gamma) == 2.0

    def kernel(x_ref, t_ref, o_ref):
        # x_ref: (C, tn) f32 logits (classes on sublanes, pixels on lanes)
        # t_ref: (1, tn) i32 labels, o_ref: (1, tn) f32 per-pixel loss
        x = x_ref[...]
        labels = t_ref[...]                                  # (1, tn) i32

        # numerically-stable softmax over the class (sublane) axis
        m = jnp.max(x, axis=0, keepdims=True)                # (1, tn)
        e = jnp.exp(x - m)                                   # (C, tn)
        s = jnp.sum(e, axis=0, keepdims=True)                # (1, tn)
        inv = pl.reciprocal(s, approx=True)                  # EUP slot
        inv = inv * (2.0 - s * inv)                          # Newton step -> f32-exact
        soft = e * inv + SOFTMAX_EPS                         # (C, tn)

        w = 1.0 - soft
        if gamma_is_two:
            weight = w * w                                   # gamma == 2.0 (VALU only)
        else:
            weight = jnp.power(jnp.maximum(w, 0.0), gamma)
        focal = (-alpha) * weight * jnp.log(soft)            # (C, tn)

        rows = jax.lax.broadcasted_iota(jnp.int32, x.shape, 0)       # (C, tn)
        onehot = jnp.where(rows == labels, 1.0, 0.0) + ONEHOT_EPS    # one_hot(...) + eps

        o_ref[...] = jnp.sum(onehot * focal, axis=0, keepdims=True)  # (1, tn)

    out = pl.pallas_call(
        kernel,
        out_shape=jax.ShapeDtypeStruct((N, 1, HW_pad), jnp.float32),
        grid_spec=pltpu.PrefetchScalarGridSpec(
            num_scalar_prefetch=0,
            grid=(N, n_tiles),
            in_specs=[
                # (C, tn) logits block; leading batch dim squeezed out.
                pl.BlockSpec((None, C, tn), lambda n, j: (n, 0, j)),
                # (1, tn) labels block.
                pl.BlockSpec((None, 1, tn), lambda n, j: (n, 0, j)),
            ],
            # Lane-dense (1, tn) output block.
            out_specs=pl.BlockSpec((None, 1, tn), lambda n, j: (n, 0, j)),
        ),
        compiler_params=pltpu.CompilerParams(
            # both axes independent -> megacore / 2-TC sharding on v7x
            dimension_semantics=("parallel", "parallel")),
    )(x3, t3)

    return out[:, 0, :HW].reshape(N, H, W)


def _focal_loss_ref(logits_nchw, target_nhw, alpha=ALPHA, gamma=GAMMA):
    # pure-JAX reference mirroring the torch code, for a correctness check
    soft = jax.nn.softmax(logits_nchw, axis=1) + SOFTMAX_EPS          # (N,C,H,W)
    C = logits_nchw.shape[1]
    oh = jax.nn.one_hot(target_nhw, C, axis=1, dtype=jnp.float32) + ONEHOT_EPS
    weight = jnp.power(1.0 - soft, gamma)
    focal = -alpha * weight * jnp.log(soft)
    return jnp.sum(oh * focal, axis=1)                                # (N,H,W)


if __name__ == "__main__":
    key = jax.random.PRNGKey(0)
    k1, k2 = jax.random.split(key)
    N, C, H, W = 2, 8, 16, 16
    logits = jax.random.normal(k1, (N, C, H, W), dtype=jnp.float32)
    target = jax.random.randint(k2, (N, H, W), 0, C, dtype=jnp.int32)

    loss = focal_loss_pallas(logits, target)
    jax.block_until_ready(loss)

    ref = _focal_loss_ref(logits, target)
    assert loss.shape == (N, H, W)
    # slightly relaxed rtol for EUP exp/log/reciprocal ulp-level differences
    assert jnp.allclose(loss, ref, atol=1e-5, rtol=1e-4), "mismatch vs reference"
    print("KERNEL_OK")
</pallas_src>

<mosaic_0001>
module attributes {stable_mosaic.version = 11 : i64} {
  func.func @kernel(%arg0: i32, %arg1: i32, %arg2: memref<1x8x256xf32, #tpu.memory_space<vmem>>, %arg3: memref<1x1x256xi32, #tpu.memory_space<vmem>>, %arg4: memref<1x1x256xf32, #tpu.memory_space<vmem>>) attributes {dimension_semantics = [#tpu.dimension_semantics<parallel>, #tpu.dimension_semantics<parallel>], iteration_bounds = array<i64: 2, 1>, scalar_prefetch = 0 : i64, scratch_operands = 0 : i64, tpu.core_type = #tpu.core_type<tc>, window_params = [{transform_indices = @transform_0, window_bounds = array<i64: 1, 8, 256>}, {transform_indices = @transform_1, window_bounds = array<i64: 1, 1, 256>}, {transform_indices = @transform_2, window_bounds = array<i64: 1, 1, 256>}]} {
    %c0 = arith.constant 0 : index
    %c0_0 = arith.constant 0 : index
    %c0_1 = arith.constant 0 : index
    %0 = vector.load %arg2[%c0, %c0_0, %c0_1] : memref<1x8x256xf32, #tpu.memory_space<vmem>>, vector<1x8x256xf32>
    %1 = vector.shape_cast %0 : vector<1x8x256xf32> to vector<8x256xf32>
    %c0_2 = arith.constant 0 : index
    %c0_3 = arith.constant 0 : index
    %c0_4 = arith.constant 0 : index
    %2 = vector.load %arg3[%c0_2, %c0_3, %c0_4] : memref<1x1x256xi32, #tpu.memory_space<vmem>>, vector<1x1x256xi32>
    %3 = vector.shape_cast %2 : vector<1x1x256xi32> to vector<1x256xi32>
    %cst = arith.constant dense<0xFF800000> : vector<256xf32>
    %4 = vector.multi_reduction <maximumf>, %1, %cst [0] : vector<8x256xf32> to vector<256xf32>
    %5 = vector.shape_cast %4 : vector<256xf32> to vector<1x256xf32>
    %6 = vector.broadcast %5 : vector<1x256xf32> to vector<8x256xf32>
    %7 = arith.subf %1, %6 : vector<8x256xf32>
    %8 = math.exp %7 : vector<8x256xf32>
    %cst_5 = arith.constant dense<0.000000e+00> : vector<256xf32>
    %9 = vector.multi_reduction <add>, %8, %cst_5 [0] : vector<8x256xf32> to vector<256xf32>
    %10 = vector.shape_cast %9 : vector<256xf32> to vector<1x256xf32>
    %11 = tpu.reciprocal %10 {approx = true} : vector<1x256xf32> -> vector<1x256xf32>
    %12 = arith.mulf %10, %11 : vector<1x256xf32>
    %cst_6 = arith.constant 2.000000e+00 : f32
    %13 = vector.broadcast %cst_6 : f32 to vector<1x256xf32>
    %14 = arith.subf %13, %12 : vector<1x256xf32>
    %15 = arith.mulf %11, %14 : vector<1x256xf32>
    %16 = vector.broadcast %15 : vector<1x256xf32> to vector<8x256xf32>
    %17 = arith.mulf %8, %16 : vector<8x256xf32>
    %cst_7 = arith.constant 9.99999997E-7 : f32
    %18 = vector.broadcast %cst_7 : f32 to vector<8x256xf32>
    %19 = arith.addf %17, %18 : vector<8x256xf32>
    %cst_8 = arith.constant 1.000000e+00 : f32
    %20 = vector.broadcast %cst_8 : f32 to vector<8x256xf32>
    %21 = arith.subf %20, %19 : vector<8x256xf32>
    %22 = arith.mulf %21, %21 : vector<8x256xf32>
    %cst_9 = arith.constant -2.500000e-01 : f32
    %23 = vector.broadcast %cst_9 : f32 to vector<8x256xf32>
    %24 = arith.mulf %23, %22 : vector<8x256xf32>
    %25 = math.log %19 : vector<8x256xf32>
    %26 = arith.mulf %24, %25 : vector<8x256xf32>
    %27 = tpu.iota {dimensions = array<i32: 0>} : vector<8x256xi32>
    %28 = vector.broadcast %3 : vector<1x256xi32> to vector<8x256xi32>
    %29 = arith.cmpi eq, %27, %28 : vector<8x256xi32>
    %cst_10 = arith.constant 1.000000e+00 : f32
    %cst_11 = arith.constant 0.000000e+00 : f32
    %30 = vector.broadcast %cst_10 : f32 to vector<8x256xf32>
    %31 = vector.broadcast %cst_11 : f32 to vector<8x256xf32>
    %32 = arith.select %29, %30, %31 : vector<8x256xi1>, vector<8x256xf32>
    %cst_12 = arith.constant 9.99999997E-7 : f32
    %33 = vector.broadcast %cst_12 : f32 to vector<8x256xf32>
    %34 = arith.addf %32, %33 : vector<8x256xf32>
    %35 = arith.mulf %34, %26 : vector<8x256xf32>
    %cst_13 = arith.constant dense<0.000000e+00> : vector<256xf32>
    %36 = vector.multi_reduction <add>, %35, %cst_13 [0] : vector<8x256xf32> to vector<256xf32>
    %37 = vector.shape_cast %36 : vector<256xf32> to vector<1x256xf32>
    %c0_14 = arith.constant 0 : index
    %c0_15 = arith.constant 0 : index
    %c0_16 = arith.constant 0 : index
    %38 = vector.load %arg4[%c0_14, %c0_15, %c0_16] : memref<1x1x256xf32, #tpu.memory_space<vmem>>, vector<1x1x256xf32>
    %39 = vector.shape_cast %38 : vector<1x1x256xf32> to vector<1x256xf32>
    %40 = vector.shape_cast %37 : vector<1x256xf32> to vector<1x1x256xf32>
    tpu.vector_store %arg4[%c0_14, %c0_15, %c0_16], %40 {strides = array<i32>} : memref<1x1x256xf32, #tpu.memory_space<vmem>>, vector<1x1x256xf32>,
    return
  }
  func.func @transform_0(%arg0: i32, %arg1: i32) -> (i32, i32, i32) {
    %c0_i32 = arith.constant 0 : i32
    %c0_i32_0 = arith.constant 0 : i32
    return %arg0, %c0_i32, %arg1 : i32, i32, i32
  }
  func.func @transform_1(%arg0: i32, %arg1: i32) -> (i32, i32, i32) {
    %c0_i32 = arith.constant 0 : i32
    %c0_i32_0 = arith.constant 0 : i32
    return %arg0, %c0_i32, %arg1 : i32, i32, i32
  }
  func.func @transform_2(%arg0: i32, %arg1: i32) -> (i32, i32, i32) {
    %c0_i32 = arith.constant 0 : i32
    %c0_i32_0 = arith.constant 0 : i32
    return %arg0, %c0_i32, %arg1 : i32, i32, i32
  }
}

</mosaic_0001>

<bundles_post_ra>
// kernel: tpu_custom_call.1
= control target key start
LH: loop header
LB: loop body
LE: loop exit
PB: predicated region body
PF: predicated region fallthrough
CT: control target
= control target key end

     0   :  { %7 = vsyncpa [#allocation3], 0  ;;  %s851_s0 = inlined_call_operand.hbm [shape: f32[2,8,256], index: 0, kind: input, shape index: {}]   ;;  %s852_s1 = inlined_call_operand.hbm [shape: s32[2,1,256], index: 1, kind: input, shape index: {}]   ;;  %s853_s2 = inlined_call_operand.hbm [shape: f32[2,1,256], index: 2, kind: output, shape index: {}]  }
   0x1   :  { %9 = vsyncpa [#allocation3 + $0x1], 0 }
   0x2   :  { %10 = vsyncpa [#allocation6], 0 }
   0x3   :  { %12 = vsyncpa [#allocation6 + $0x1], 0 }
   0x4   :  { %13 = vsyncpa [#allocation4], 0 }
   0x5   :  { %15 = vsyncpa [#allocation4 + $0x1], 0  ;;  %s706_s9 = smov 0   ;;  %s708_s10 = smov 0  }
   0x6   :  { %s710_s11 = smov 0   ;;  %s712_s12 = smov 0  }
   0x7   :  { %s714_s13 = smov 0   ;;  %s716_s14 = smov 0  }
   0x8 LB: > { %s444_s15 = sadd.s32 4294967295, %s688_s14   ;;  %s445_s16 = sadd.s32 4294967294, %s688_s14   ;;  %s688_s14 = sphi %s716_s14, %s21_s14   ;;  %s684_s13 = sphi %s714_s13, %s863_s13   ;;  %s680_s12 = sphi %s712_s12, %s862_s12   ;;  %s676_s11 = sphi %s710_s11, %s861_s11   ;;  %s672_s10 = sphi %s708_s10, %s860_s10   ;;  %s668_s9 = sphi %s706_s9, %s859_s9  }
   0x9   : > { %s33_s17 = sadd.s32 1, %s684_s13  ;;  %s42_s18 = sadd.s32 1, %s676_s11 }
   0xa   : > { %p35_p0 = scmp.ge.s32.totalorder %s33_s17, 2  ;;  %p49_p1 = scmp.ne.s32.totalorder %s676_s11, %s672_s10 }
   0xb   : > { %p50_p2 = scmp.eq.s32.totalorder %s688_s14, 0  ;;  %p55_p3 = scmp.ne.s32.totalorder %s672_s10, %s668_s9 }
   0xc   : > { %s865_s17 = smov (%p35_p0, %s33_s17), 0  ;;  %p56_p5 = scmp.eq.s32.totalorder %s444_s15, 0 }
   0xd   : > { %p747_p4 = por %p50_p2, %p49_p1  ;;  %s37_s20 = ssub.s32 %s684_s13, %s865_s17 }
   0xe   : > { %p109_p6 = scmp.eq.s32.totalorder %s444_s15, 1  ;;  %p40_p7 = scmp.eq.s32.totalorder %s37_s20, 0 }
   0xf   : > { %p753_p8 = por %p56_p5, %p55_p3  ;;  %p115_p10 = scmp.eq.s32.totalorder %s445_s16, 1 }
  0x10   : > { %p757_p9 = por %p109_p6, %p49_p1  ;;  %p447_p12 = scmp.ge.s32.totalorder %s688_s14, 2 }
  0x11   : > { %s762_s23 = scalar_select %p40_p7, %s676_s11, %s42_s18  }
  0x12   : > { %p764_p11 = por %p115_p10, %p55_p3  ;;  %p479_p13 = scmp.lt.s32.totalorder %s688_s14, 2 }
  0x13   : > { %s135_s25 = sand.u32 1, %s676_s11   ;;  %s461_s27 = sshll.u32 %s684_s13, 4 }
  0x14   : > { %s448_s26 = sshll.u32 %s135_s25, 4  ;;  %s146_s30 = scalar_lea.hbm %s851_s0, %s461_s27 }
  0x15   : > { %s139_s3 = scalar_lea.vmem [#allocation2], %s448_s26  ;;  %s148_s5 = sshll.u32 %s146_s30, 4  ;;  %s149_s5 = int_to_ptr.hbm [resolvable:$true] %s148_s5 }
  0x16   : > { %s150_s4 = sshll.u32 %s139_s3, 4  ;;  %p777_p0 = pnand %p479_p13, %p747_p4  ;;  %s151_s4 = int_to_ptr.vmem [resolvable:$true] %s150_s4 }
  0x17   : > { %p453_p1 = scmp.ge.s32.totalorder %s688_s14, 1  ;;  %p176_p2 = scmp.lt.s32.totalorder %s688_s14, 3 }
  0x18   : > { %s136_s7 = scalar_lea.sflag [#allocation3], %s135_s25  ;;  %s451_s8 = sshll.u32 %s135_s25, 1 }
  0x19   : > { %471 = dma.hbm_to_vmem [thread:$0]  (!%p777_p0), %s149_s5, 256, %s151_s4, %s136_s7  }
  0x1a   : > { %p177_p3 = pnand %p453_p1, %p176_p2  ;;  %s452_s15 = sshll.u32 %s684_s13, 1 }
  0x1b   : > { %s167_s20 = scalar_lea.hbm %s852_s1, %s452_s15  ;;  %s161_s26 = scalar_lea.vmem [#allocation5], %s451_s8 }
  0x1c   : > { %s171_s19 = sshll.u32 %s161_s26, 4  ;;  %s169_s27 = sshll.u32 %s167_s20, 4  ;;  %s172_s19 = int_to_ptr.vmem [resolvable:$true] %s171_s19  ;;  %s170_s27 = int_to_ptr.hbm [resolvable:$true] %s169_s27 }
  0x1d   : > { %s158_s28 = scalar_lea.sflag [#allocation6], %s135_s25  ;;  %180 = sbr.rel (%p177_p3) target bundleno = 123 (0x7b), region = 28 }
  0x1e   : > { %474 = dma.hbm_to_vmem [thread:$0]  (!%p777_p0), %s170_s27, 32, %s172_s19, %s158_s28  }
  0x1f   : > { %s792_s29 = sand.u32 (!%p177_p3), 1, %s672_s10  }
  0x20   : > { %s454_s30 = sshll.u32 (!%p177_p3), %s792_s29, 4  ;;  %s183_s3 = scalar_lea.sflag (!%p177_p3), [#allocation3], %s792_s29 }
  0x21   : > { %s186_s4 = scalar_lea.vmem (!%p177_p3), [#allocation2], %s454_s30 }
  0x22   : > { %655 = dma.done.wait (%p753_p8), %s183_s3, 256  }
  0x23   : > { %657 = vsyncadd (%p753_p8), %s183_s3, 4294967040  ;;  %s455_s25 = sshll.u32 %s792_s29, 1  ;;  %s193_s5 = scalar_lea.sflag [#allocation6], %s792_s29 }
  0x24   : > { %s804_s6 = scalar_lea.vmem [#allocation5], %s455_s25 }
  0x25   : > { %659 = dma.done.wait (%p753_p8), %s193_s5, 32  }
  0x26   : > { %661 = vsyncadd (%p753_p8), %s193_s5, 4294967264  ;;  %v226_v0 = vld [vmem:[%s186_s4] sm:$0xff]  ;;  %v227_v1 = vld [vmem:[%s186_s4 + $0x8] sm:$0xff]  ;;  %v283_v39 = vlaneseq  ;;  %v690_v53 = vmov 0.0   ;;  %s458_s21 = sshll.u32 %s680_s12, 1  ;;  %s222_s16 = scalar_lea.vmem [#allocation7], %s455_s25 }
  0x27   : > { %v229_v2 = vrot.slane %v226_v0, 4  ;;  %v235_v3 = vrot.slane %v227_v1, 4  ;;  %v228_v40 = vld [vmem:[%s804_s6] sm:$0x3]  ;;  %s331_s15 = scalar_lea.hbm %s853_s2, %s458_s21  ;;  %s333_s18 = sshll.u32 %s222_s16, 4  ;;  %vm310_vm2 = vcmask 1040384   ;;  %s334_s18 = int_to_ptr.vmem [resolvable:$true] %s333_s18 }
  0x28   : > { %v285_v44 = vperm.slane %v228_v40, 0  ;;  %v284_v46 = vshrl.u32 %v283_v39, 7  ;;  %v286_v47 = vperm.slane %v228_v40, 1  ;;  %s335_s20 = sshll.u32 %s331_s15, 4  ;;  %vm315_vm3 = vcmp.lt.s32.totalorder %v283_v39, 256  ;;  %s319_s12 = scalar_lea.sflag [#allocation4], %s792_s29  ;;  %s336_s20 = int_to_ptr.hbm [resolvable:$true] %s335_s20 }
  0x29   : > { %v230_v4 = vmax.f32 %v226_v0, %v229_v2  ;;  %v236_v5 = vmax.f32 %v227_v1, %v235_v3  ;;  %s616_s26 = sshra.s32 %s336_s20, 4  ;;  %s622_s30 = scalar_lea.hbm %s853_s2, 4  ;;  %s617_s26 = int_to_ptr.hbm [resolvable:$true] %s616_s26 }
  0x2a   : > { %vm287_vm0 = vcmp.eq.s32.totalorder %v284_v46, %v285_v44  ;;  %vm288_vm1 = vcmp.eq.s32.totalorder %v284_v46, %v286_v47  ;;  %s618_s19 = scalar_lea.hbm %s617_s26, 2  ;;  %p623_p7 = scmp.lt.s32.totalorder %s617_s26, %s853_s2 }
  0x2b   : > { %v231_v6 = vrot.slane %v230_v4, 2  ;;  %v237_v7 = vrot.slane %v236_v5, 2  ;;  %v289_v54 = vsel %vm287_vm0, 1.0, %v690_v53  ;;  %v290_v56 = vsel %vm288_vm1, 1.0, %v690_v53  ;;  %p619_p4 = scmp.ne.s32.totalorder %s617_s26, %s618_s19  ;;  %p624_p8 = scmp.lt.s32.totalorder %s622_s30, %s618_s19 }
  0x2c   : > { %v291_v61 = vadd.f32 1e-06, %v289_v54  ;;  %v292_v63 = vadd.f32 1e-06, %v290_v56 }
  0x2d   : > { %v232_v8 = vmax.f32 %v230_v4, %v231_v6  ;;  %v238_v9 = vmax.f32 %v236_v5, %v237_v7  ;;  %p620_p5 = pnand %p619_p4, %p757_p9  ;;  %p625_p10 = por %p624_p8, %p623_p7 }
  0x2f   : > { %v233_v10 = vrot.slane %v232_v8, 1  ;;  %v239_v11 = vrot.slane %v238_v9, 1  ;;  %p621_p6 = pneg %p620_p5 }
  0x31   : > { %v234_v12 = vmax.f32 %v232_v8, %v233_v10  ;;  %v240_v13 = vmax.f32 %v238_v9, %v239_v11  ;;  %p626_p13 = pnand %p625_p10, %p621_p6 }
  0x33   : > { %v241_v14 = vsub.f32 %v226_v0, %v234_v12  ;;  %v242_v15 = vsub.f32 %v227_v1, %v240_v13 }
  0x35   : > { %v243_v16 = vmul.f32 1.442695, %v241_v14  ;;  %v245_v17 = vmul.f32 1.442695, %v242_v15 }
  0x37   : > { %530 = vpow2.f32 %v243_v16 }
  0x38   : > { %532 = vpow2.f32 %v245_v17 }
  0x3d   : > { %v531_v18 = vpop.eup %530 }
  0x3e   : > { %v533_v19 = vpop.eup %532  ;;  %v247_v20 = vrot.slane %v531_v18, 4 }
  0x3f   : > { %v253_v21 = vrot.slane %v533_v19, 4 }
  0x40   : > { %v248_v22 = vadd.f32 %v531_v18, %v247_v20 }
  0x41   : > { %v254_v23 = vadd.f32 %v533_v19, %v253_v21 }
  0x42   : > { %v249_v24 = vrot.slane %v248_v22, 2 }
  0x43   : > { %v255_v25 = vrot.slane %v254_v23, 2 }
  0x44   : > { %v250_v26 = vadd.f32 %v249_v24, %v248_v22 }
  0x45   : > { %v256_v27 = vadd.f32 %v255_v25, %v254_v23 }
  0x46   : > { %v251_v28 = vrot.slane %v250_v26, 1 }
  0x47   : > { %v257_v29 = vrot.slane %v256_v27, 1 }
  0x48   : > { %v252_v30 = vadd.f32 %v251_v28, %v250_v26 }
  0x49   : > { %v258_v31 = vadd.f32 %v257_v29, %v256_v27 }
  0x4a   : > { %534 = vrcp.f32 %v252_v30 }
  0x4b   : > { %536 = vrcp.f32 %v258_v31 }
  0x50   : > { %v535_v32 = vpop.eup %534 }
  0x51   : > { %v537_v33 = vpop.eup %536  ;;  %v261_v34 = vmul.f32 %v535_v32, %v252_v30 }
  0x52   : > { %v262_v35 = vmul.f32 %v537_v33, %v258_v31 }
  0x53   : > { %v263_v36 = vsub.f32 2.0, %v261_v34 }
  0x54   : > { %v264_v37 = vsub.f32 2.0, %v262_v35 }
  0x55   : > { %v265_v38 = vmul.f32 %v535_v32, %v263_v36 }
  0x56   : > { %v266_v41 = vmul.f32 %v537_v33, %v264_v37 }
  0x57   : > { %v267_v42 = vmul.f32 %v531_v18, %v265_v38 }
  0x58   : > { %v268_v43 = vmul.f32 %v533_v19, %v266_v41 }
  0x59   : > { %v269_v45 = vadd.f32 1e-06, %v267_v42 }
  0x5a   : > { %v270_v48 = vadd.f32 1e-06, %v268_v43 }
  0x5b   : > { %v271_v49 = vsub.f32 1.0, %v269_v45  ;;  %538 = vlog2.f32 %v269_v45 }
  0x5c   : > { %v272_v50 = vsub.f32 1.0, %v270_v48  ;;  %540 = vlog2.f32 %v270_v48 }
  0x5d   : > { %v273_v51 = vmul.f32 %v271_v49, %v271_v49 }
  0x5e   : > { %v274_v52 = vmul.f32 %v272_v50, %v272_v50 }
  0x5f   : > { %v275_v55 = vmul.f32 -0.25, %v273_v51 }
  0x60   : > { %v276_v58 = vmul.f32 -0.25, %v274_v52 }
  0x61   : > { %v539_v57 = vpop.eup %538 }
  0x62   : > { %v541_v59 = vpop.eup %540  ;;  %v278_v60 = vmul.f32 0.6931472, %v539_v57 }
  0x63   : > { %v280_v62 = vmul.f32 0.6931472, %v541_v59 }
  0x64   : > { %v281_v0 = vmul.f32 %v278_v60, %v275_v55 }
  0x65   : > { %v282_v1 = vmul.f32 %v280_v62, %v276_v58 }
  0x66   : > { %v293_v2 = vmul.f32 %v291_v61, %v281_v0 }
  0x67   : > { %v294_v3 = vmul.f32 %v292_v63, %v282_v1 }
  0x68   : > { %v295_v4 = vrot.slane %v293_v2, 4 }
  0x69   : > { %v301_v5 = vrot.slane %v294_v3, 4 }
  0x6a   : > { %v296_v6 = vadd.f32 %v295_v4, %v293_v2 }
  0x6b   : > { %v302_v7 = vadd.f32 %v301_v5, %v294_v3 }
  0x6c   : > { %v297_v8 = vrot.slane %v296_v6, 2 }
  0x6d   : > { %v303_v9 = vrot.slane %v302_v7, 2 }
  0x6e   : > { %v298_v10 = vadd.f32 %v297_v8, %v296_v6 }
  0x6f   : > { %v304_v11 = vadd.f32 %v303_v9, %v302_v7 }
  0x70   : > { %v299_v12 = vrot.slane %v298_v10, 1 }
  0x71   : > { %v305_v13 = vrot.slane %v304_v11, 1 }
  0x72   : > { %v300_v14 = vadd.f32 %v299_v12, %v298_v10 }
  0x73   : > { %v306_v15 = vadd.f32 %v305_v13, %v304_v11 }
  0x75   : > { %v309_v16 = vrot.slane %v306_v15, 7 }
  0x77   : > { %v311_v17 = vsel %vm310_vm2, %v300_v14, %v309_v16 }
  0x78   : > { %317 = vst.msk [vmem:[%s222_s16] sm:$0x3] %vm315_vm3, %v311_v17 }
  0x79   : > { %629 = shalt.err (!%p626_p13)
}
  0x7a   : > { %466 = dma.vmem_to_hbm [thread:$0]  (%p757_p9), %s334_s18, 32, %s336_s20, %s319_s12  }
  0x7b PF: > { %s347_s29 = sand.u32 1, %s668_s9   ;;  %p476_p0 = pnand %p447_p12, %p764_p11 }
  0x7c   : > { %s348_s25 = scalar_lea.sflag [#allocation4], %s347_s29 }
  0x7d   : > { %p477_p1 = pneg %p476_p0 }
  0x7f   : > { %663 = dma.done.wait (%p477_p1), %s348_s25, 32  }
  0x80   : > { %665 = vsyncadd (%p477_p1), %s348_s25, 4294967264  ;;  %s21_s14 = sadd.s32 1, %s688_s14   ;;  %s859_s9 = smov %s672_s10 }
  0x81   : > { %p18_p2 = scmp.ge.s32.totalorder %s21_s14, 4   ;;  %s860_s10 = smov %s676_s11 }
  0x82   : > { %s861_s11 = smov %s762_s23  ;;  %s862_s12 = smov %s684_s13 }
  0x83   : > { %s863_s13 = smov %s865_s17  ;;  %20 = sbr.rel (!%p18_p2) target bundleno = 8 (0x8), region = 86 }
  0x88   :  { %354 = vsyncpa [#allocation3], 1 }
  0x89   :  { %356 = vsyncpa [#allocation3 + $0x1], 1 }
  0x8a   :  { %357 = vsyncpa [#allocation6], 1 }
  0x8b   :  { %359 = vsyncpa [#allocation6 + $0x1], 1 }
  0x8c   :  { %360 = vsyncpa [#allocation4], 1 }
  0x8d   :  { %362 = vsyncpa [#allocation4 + $0x1], 1 }

</bundles_post_ra>
